<compile_context>
chip_gen: v6e
topology: v6e:2x2x1
jax: 0.10.0
libtpu: 0.0.40
codegen_flags: <defaults>
</compile_context>

<pallas_src>
import jax
import jax.numpy as jnp
from jax import lax
from jax.experimental import pallas as pl
from jax.experimental.pallas import tpu as pltpu

D_IN = 64     # Linear in_features
D_H = 32      # Linear out_features
SCALE = 8.0   # sqrt(64.0) == self.scale_factor
TQ_MAX = 256  # max query-row tile


def _round_up(x, m):
    return ((x + m - 1) // m) * m


def sdp_kernel(xq_ref, xkv_ref, w_ref, b_ref, o_ref):
    # xq:  (TQ, 64)  current query-row tile (padded rows allowed; discarded later)
    # xkv: (N, 64)   full keys/values, resident across grid steps
    # w:   (64, 64)  fused [wq * 1/sqrt(64) | wk]
    # b:   (1, 64)   fused [bq * 1/sqrt(64) | bk]
    # o:   (TQ, 64)
    xq = xq_ref[...]
    xkv = xkv_ref[...]
    w = w_ref[...]
    b = b_ref[...]

    # Fused projection of the query tile (64-lane MXU pass); q half already scaled.
    qk_tile = jnp.dot(xq, w, preferred_element_type=jnp.float32) + b
    q = qk_tile[:, :D_H]                                           # (TQ, 32)

    # Key projection over all (resident) rows: v2 = key(x) (dropout = identity).
    k = jnp.dot(xkv, w[:, D_H:], preferred_element_type=jnp.float32) + b[:, D_H:]  # (N, 32)

    # Scores: contract last dims directly (no transpose materialization).
    s = lax.dot_general(q, k, (((1,), (1,)), ((), ())),
                        preferred_element_type=jnp.float32)        # (TQ, N)

    # Numerically-stable softmax along the key axis.
    s = s - jnp.max(s, axis=-1, keepdims=True)
    p = jnp.exp(s)
    p = p * pl.reciprocal(jnp.sum(p, axis=-1, keepdims=True), approx=False)

    # v7 = softmax @ x  (dropout = identity).
    o_ref[...] = jnp.dot(p, xkv, preferred_element_type=jnp.float32).astype(o_ref.dtype)


def model_forward(x, wq_t, bq, wk_t, bk):
    """x: (N, 64); wq_t/wk_t: (64, 32) pre-transposed Linear weights; bq/bk: (32,)."""
    n, d = x.shape
    assert d == D_IN

    # Fold the 1/sqrt(64) scale (power of two -> exact) into the query params and
    # fuse query/key params into one weight/bias.
    w_fused = jnp.concatenate([wq_t * (1.0 / SCALE), wk_t], axis=1)          # (64, 64)
    b_fused = jnp.concatenate([bq * (1.0 / SCALE), bk]).reshape(1, 2 * D_H)  # (1, 64)

    # Tile over query rows; pad rows to a multiple of the tile (padded query rows
    # attend to the *unpadded* keys, so their outputs are valid but discarded).
    tq = min(TQ_MAX, _round_up(n, 8))
    n_pad = _round_up(n, tq)
    x_q = x if n_pad == n else jnp.pad(x, ((0, n_pad - n), (0, 0)))

    out = pl.pallas_call(
        sdp_kernel,
        out_shape=jax.ShapeDtypeStruct((n_pad, D_IN), jnp.float32),
        grid_spec=pltpu.PrefetchScalarGridSpec(
            num_scalar_prefetch=0,
            grid=(n_pad // tq,),
            in_specs=[
                pl.BlockSpec((tq, D_IN), lambda i: (i, 0)),        # query rows (tiled)
                pl.BlockSpec((n, D_IN), lambda i: (0, 0)),         # keys/values (resident)
                pl.BlockSpec((D_IN, 2 * D_H), lambda i: (0, 0)),   # fused weight
                pl.BlockSpec((1, 2 * D_H), lambda i: (0, 0)),      # fused bias
            ],
            out_specs=pl.BlockSpec((tq, D_IN), lambda i: (i, 0)),
        ),
        compiler_params=pltpu.CompilerParams(
            dimension_semantics=("parallel",),      # shard row tiles across TCs (v7x)
            vmem_limit_bytes=64 * 1024 * 1024,      # explicit limit, fits all gens
        ),
    )(x_q, x, w_fused, b_fused)
    return out[:n]


def reference_forward(x, wq_t, bq, wk_t, bk):
    q = x @ wq_t + bq
    k = x @ wk_t + bk
    s = (q @ k.T) / SCALE
    p = jax.nn.softmax(s, axis=-1)
    return p @ x


if __name__ == "__main__":
    key = jax.random.PRNGKey(0)
    k_x, k_wq, k_bq, k_wk, k_bk, k_x2 = jax.random.split(key, 6)

    # Deterministic Linear(64, 32) params; weight stored pre-transposed (64, 32).
    bound = 1.0 / jnp.sqrt(jnp.float32(D_IN))
    wq_t = jax.random.uniform(k_wq, (D_IN, D_H), jnp.float32, -bound, bound)
    bq = jax.random.uniform(k_bq, (D_H,), jnp.float32, -bound, bound)
    wk_t = jax.random.uniform(k_wk, (D_IN, D_H), jnp.float32, -bound, bound)
    bk = jax.random.uniform(k_bk, (D_H,), jnp.float32, -bound, bound)

    # Case 1: matches the PyTorch module input x1 = torch.randn(1, 64).
    x1 = jax.random.normal(k_x, (1, D_IN), dtype=jnp.float32)
    out1 = jax.block_until_ready(model_forward(x1, wq_t, bq, wk_t, bk))
    ref1 = reference_forward(x1, wq_t, bq, wk_t, bk)
    assert out1.shape == (1, D_IN)
    assert jnp.allclose(out1, ref1, atol=1e-4, rtol=1e-4), "mismatch vs reference (N=1)"

    # Case 2: larger N to exercise row tiling, padding and the parallel grid axis.
    x2 = jax.random.normal(k_x2, (300, D_IN), dtype=jnp.float32)
    out2 = jax.block_until_ready(model_forward(x2, wq_t, bq, wk_t, bk))
    ref2 = reference_forward(x2, wq_t, bq, wk_t, bk)
    assert out2.shape == (300, D_IN)
    assert jnp.allclose(out2, ref2, atol=1e-4, rtol=1e-4), "mismatch vs reference (N=300)"

    print("KERNEL_OK")
</pallas_src>

<mosaic_0001>
module attributes {stable_mosaic.version = 11 : i64} {
  func.func @sdp_kernel(%arg0: i32, %arg1: memref<8x64xf32, #tpu.memory_space<vmem>>, %arg2: memref<1x64xf32, #tpu.memory_space<vmem>>, %arg3: memref<64x64xf32, #tpu.memory_space<vmem>>, %arg4: memref<1x64xf32, #tpu.memory_space<vmem>>, %arg5: memref<8x64xf32, #tpu.memory_space<vmem>>) attributes {dimension_semantics = [#tpu.dimension_semantics<parallel>], iteration_bounds = array<i64: 1>, scalar_prefetch = 0 : i64, scratch_operands = 0 : i64, tpu.core_type = #tpu.core_type<tc>, window_params = [{transform_indices = @transform_0, window_bounds = array<i64: 8, 64>}, {pipeline_mode = #tpu.pipeline_mode<synchronous>, transform_indices = @transform_1, window_bounds = array<i64: 1, 64>}, {pipeline_mode = #tpu.pipeline_mode<synchronous>, transform_indices = @transform_2, window_bounds = array<i64: 64, 64>}, {pipeline_mode = #tpu.pipeline_mode<synchronous>, transform_indices = @transform_3, window_bounds = array<i64: 1, 64>}, {transform_indices = @transform_4, window_bounds = array<i64: 8, 64>}]} {
    %c0 = arith.constant 0 : index
    %c0_0 = arith.constant 0 : index
    %0 = vector.load %arg1[%c0, %c0_0] : memref<8x64xf32, #tpu.memory_space<vmem>>, vector<8x64xf32>
    %c0_1 = arith.constant 0 : index
    %c0_2 = arith.constant 0 : index
    %1 = vector.load %arg2[%c0_1, %c0_2] : memref<1x64xf32, #tpu.memory_space<vmem>>, vector<1x64xf32>
    %c0_3 = arith.constant 0 : index
    %c0_4 = arith.constant 0 : index
    %2 = vector.load %arg3[%c0_3, %c0_4] : memref<64x64xf32, #tpu.memory_space<vmem>>, vector<64x64xf32>
    %c0_5 = arith.constant 0 : index
    %c0_6 = arith.constant 0 : index
    %3 = vector.load %arg4[%c0_5, %c0_6] : memref<1x64xf32, #tpu.memory_space<vmem>>, vector<1x64xf32>
    %cst = arith.constant dense<0.000000e+00> : vector<8x64xf32>
    %4 = tpu.matmul %0, %2, %cst {dimension_numbers = #tpu.dot_dimension_numbers<[1], [0], [0], [1], [0, 0, 1, 1], [], []>} : vector<8x64xf32>, vector<64x64xf32>, vector<8x64xf32> -> vector<8x64xf32>
    %5 = vector.broadcast %3 : vector<1x64xf32> to vector<8x64xf32>
    %6 = arith.addf %4, %5 : vector<8x64xf32>
    %7 = vector.extract_strided_slice %6 {offsets = [0, 0], sizes = [8, 32], strides = [1, 1]} : vector<8x64xf32> to vector<8x32xf32>
    %8 = vector.extract_strided_slice %2 {offsets = [0, 32], sizes = [64, 32], strides = [1, 1]} : vector<64x64xf32> to vector<64x32xf32>
    %cst_7 = arith.constant dense<0.000000e+00> : vector<1x32xf32>
    %9 = tpu.matmul %1, %8, %cst_7 {dimension_numbers = #tpu.dot_dimension_numbers<[1], [0], [0], [1], [0, 0, 1, 1], [], []>} : vector<1x64xf32>, vector<64x32xf32>, vector<1x32xf32> -> vector<1x32xf32>
    %10 = vector.extract_strided_slice %3 {offsets = [0, 32], sizes = [1, 32], strides = [1, 1]} : vector<1x64xf32> to vector<1x32xf32>
    %11 = arith.addf %9, %10 : vector<1x32xf32>
    %cst_8 = arith.constant dense<0.000000e+00> : vector<8x1xf32>
    %12 = tpu.matmul %7, %11, %cst_8 {dimension_numbers = #tpu.dot_dimension_numbers<[1], [1], [0], [0], [0, 0, 1, 0], [], []>} : vector<8x32xf32>, vector<1x32xf32>, vector<8x1xf32> -> vector<8x1xf32>
    %cst_9 = arith.constant dense<0xFF800000> : vector<8xf32>
    %13 = vector.multi_reduction <maximumf>, %12, %cst_9 [1] : vector<8x1xf32> to vector<8xf32>
    %14 = vector.shape_cast %13 : vector<8xf32> to vector<8x1xf32>
    %15 = arith.subf %12, %14 : vector<8x1xf32>
    %16 = math.exp %15 : vector<8x1xf32>
    %cst_10 = arith.constant dense<0.000000e+00> : vector<8xf32>
    %17 = vector.multi_reduction <add>, %16, %cst_10 [1] : vector<8x1xf32> to vector<8xf32>
    %18 = vector.shape_cast %17 : vector<8xf32> to vector<8x1xf32>
    %19 = tpu.reciprocal %18 : vector<8x1xf32> -> vector<8x1xf32>
    %20 = arith.mulf %16, %19 : vector<8x1xf32>
    %cst_11 = arith.constant dense<0.000000e+00> : vector<8x64xf32>
    %21 = tpu.matmul %20, %1, %cst_11 {dimension_numbers = #tpu.dot_dimension_numbers<[1], [0], [0], [1], [0, 0, 1, 1], [], []>} : vector<8x1xf32>, vector<1x64xf32>, vector<8x64xf32> -> vector<8x64xf32>
    %c0_12 = arith.constant 0 : index
    %c0_13 = arith.constant 0 : index
    %22 = vector.load %arg5[%c0_12, %c0_13] : memref<8x64xf32, #tpu.memory_space<vmem>>, vector<8x64xf32>
    tpu.vector_store %arg5[%c0_12, %c0_13], %21 {strides = array<i32>} : memref<8x64xf32, #tpu.memory_space<vmem>>, vector<8x64xf32>,
    return
  }
  func.func @transform_0(%arg0: i32) -> (i32, i32) {
    %c0_i32 = arith.constant 0 : i32
    %c0_i32_0 = arith.constant 0 : i32
    return %arg0, %c0_i32 : i32, i32
  }
  func.func @transform_1(%arg0: i32) -> (i32, i32) {
    %c0_i32 = arith.constant 0 : i32
    %c0_i32_0 = arith.constant 0 : i32
    %c0_i32_1 = arith.constant 0 : i32
    return %c0_i32, %c0_i32_0 : i32, i32
  }
  func.func @transform_2(%arg0: i32) -> (i32, i32) {
    %c0_i32 = arith.constant 0 : i32
    %c0_i32_0 = arith.constant 0 : i32
    %c0_i32_1 = arith.constant 0 : i32
    return %c0_i32, %c0_i32_0 : i32, i32
  }
  func.func @transform_3(%arg0: i32) -> (i32, i32) {
    %c0_i32 = arith.constant 0 : i32
    %c0_i32_0 = arith.constant 0 : i32
    %c0_i32_1 = arith.constant 0 : i32
    return %c0_i32, %c0_i32_0 : i32, i32
  }
  func.func @transform_4(%arg0: i32) -> (i32, i32) {
    %c0_i32 = arith.constant 0 : i32
    %c0_i32_0 = arith.constant 0 : i32
    return %arg0, %c0_i32 : i32, i32
  }
}

</mosaic_0001>

<bundles_post_ra>
// kernel: tpu_custom_call.1
= control target key start
LH: loop header
LB: loop body
LE: loop exit
PB: predicated region body
PF: predicated region fallthrough
CT: control target
= control target key end

     0   :  { %9 = vsyncpa [#allocation3], 0  ;;  %s581_s0 = inlined_call_operand.hbm [shape: f32[8,64], index: 0, kind: input, shape index: {}]   ;;  %s582_s1 = inlined_call_operand.vmem [shape: f32[1,64], index: 1, kind: input, shape index: {}]   ;;  %s583_s2 = inlined_call_operand.hbm [shape: f32[64,64], index: 2, kind: input, shape index: {}]   ;;  %s584_s3 = inlined_call_operand.vmem [shape: f32[1,64], index: 3, kind: input, shape index: {}]   ;;  %s585_s4 = inlined_call_operand.hbm [shape: f32[8,64], index: 4, kind: output, shape index: {}]  }
   0x1   :  { %10 = vsyncpa [#allocation6], 0 }
   0x2   :  { %11 = vsyncpa [#allocation4], 0  ;;  %s498_s15 = smov [#allocation2]   ;;  %s499_s17 = smov [#allocation5]  }
   0x3   :  { %s18_s16 = sshll.u32 %s498_s15, 4  ;;  %s29_s18 = sshll.u32 %s499_s17, 4  ;;  %s19_s16 = int_to_ptr.vmem [resolvable:$true] %s18_s16  ;;  %s30_s18 = int_to_ptr.vmem [resolvable:$true] %s29_s18 }
   0x4   :  { %s440_s19 = scalar_lea.vmem %s19_s16, 128  ;;  %p445_p1 = scmp.lt.s32.totalorder %s19_s16, %s19_s16 }
   0x5   :  { %p441_p0 = scmp.ne.s32.totalorder %s19_s16, %s440_s19  ;;  %p446_p2 = scmp.lt.s32.totalorder %s440_s19, %s440_s19 }
   0x7   :  { %p447_p3 = por %p446_p2, %p445_p1 }
   0x9   :  { %p448_p4 = pnand %p447_p3, %p441_p0 }
   0xb   :  { %451 = shalt.err (!%p448_p4)
}
   0xc   :  { %21 = dma.hbm_to_vmem [thread:$0]  %s581_s0, 128, %s19_s16, [#allocation3]  }
   0xd   :  { %s460_s22 = scalar_lea.vmem %s30_s18, 1024  ;;  %p465_p6 = scmp.lt.s32.totalorder %s30_s18, %s30_s18 }
   0xe   :  { %p461_p5 = scmp.ne.s32.totalorder %s30_s18, %s460_s22  ;;  %p466_p7 = scmp.lt.s32.totalorder %s460_s22, %s460_s22 }
  0x10   :  { %p467_p8 = por %p466_p7, %p465_p6 }
  0x12   :  { %p468_p9 = pnand %p467_p8, %p461_p5 }
  0x14   :  { %471 = shalt.err (!%p468_p9)
}
  0x15   :  { %s500_s23 = smov 128   ;;  %s501_s24 = smov 8  }
  0x16   :  { %35 = dma.hbm_to_vmem [thread:$0]  %s583_s2, 1024, %s30_s18, [#allocation6], %s500_s23, %s500_s23, %s501_s24  }
  0x17   :  { %492 = dma.done.wait [#allocation3], 128  }
  0x18   :  { %493 = vsyncadd [#allocation3], 4294967168 }
  0x19   :  { %494 = dma.done.wait [#allocation6], 1024  }
  0x1a   :  { %495 = vsyncadd [#allocation6], 4294966272  ;;  %v502_v0 = vmov 0.0   ;;  %v53_v1 = vld [vmem:[#allocation5 + $0x38] sm:$0xff]  ;;  %v51_v2 = vld [vmem:[#allocation5 + $0x28] sm:$0xff]  ;;  %s503_s0 = smov 96   ;;  %v243_v22 = vlaneseq }
  0x1b   :  { %396 = vmatprep.subr.mxu1 %v502_v0  ;;  %377 = vmatprep.subr.mxu0 %v502_v0  ;;  %v52_v3 = vld [vmem:[#allocation5 + $0x30] sm:$0xff]  ;;  %v50_v4 = vld [vmem:[#allocation5 + $0x20] sm:$0xff]  ;;  %vm504_vm0 = vmmov 0   ;;  %v49_v5 = vld [vmem:[#allocation5 + $0x18] sm:$0xff]  ;;  %vm61_vm1 = vcmask 523264   ;;  %vm248_vm2 = vcmask 261120  }
  0x1c   :  { %157 = vrot.lane.b32.xlu0 %v53_v1, %s503_s0  ;;  %153 = vrot.lane.b32.xlu1 %v51_v2, %s503_s0  ;;  %v48_v6 = vld [vmem:[#allocation5 + $0x10] sm:$0xff]  ;;  %v47_v7 = vld [vmem:[#allocation5 + $0x8] sm:$0xff]  ;;  %v46_v8 = vld [vmem:[#allocation5] sm:$0xff]  ;;  %v244_v23 = vshrl.u32 %v243_v22, 7  ;;  %vm262_vm3 = vcmask 1040384   ;;  %vm258_vm4 = vcmask 7168  }
  0x1d   :  { %378 = vmatpush3.msra.mxu0 %v53_v1  ;;  %393 = vmatprep.mubr.msk.f32.mxu0 %vm504_vm0, %v502_v0  ;;  %v352_v9 = vld [vmem:[%s584_s3] ss:$0 sm:$0xff] }
  0x1e   :  { %379 = vmatprep.subr.mxu0 %v502_v0  ;;  %412 = vmatprep.mubr.msk.f32.mxu1 %vm504_vm0, %v502_v0  ;;  %v44_v10 = vld [vmem:[#allocation2] sm:$0xff]  ;;  %v245_v25 = vsub.s32 0, %v244_v23 }
  0x1f   :  { %380 = vmatpush3.msra.mxu0 %v52_v3  ;;  %v45_v19 = vld [vmem:[%s582_s1] sm:$0x1]  ;;  %s505_s1 = smov [#allocation7]  }
  0x20   :  { %155 = vrot.lane.b32.xlu0 %v52_v3, %s503_s0  ;;  %151 = vrot.lane.b32.xlu1 %v50_v4, %s503_s0  ;;  %s342_s29 = sshll.u32 %s505_s1, 4  ;;  %s343_s29 = int_to_ptr.vmem [resolvable:$true] %s342_s29 }
  0x21   :  { %381 = vmatprep.subr.mxu0 %v502_v0  ;;  %s472_s30 = scalar_lea.vmem %s343_s29, 128  ;;  %p477_p11 = scmp.lt.s32.totalorder %s343_s29, %s343_s29 }
  0x22   :  { %382 = vmatpush3.msra.mxu0 %v51_v2  ;;  %p473_p10 = scmp.ne.s32.totalorder %s343_s29, %s472_s30  ;;  %p478_p12 = scmp.lt.s32.totalorder %s472_s30, %s472_s30 }
  0x23   :  { %383 = vmatprep.subr.mxu0 %v502_v0 }
  0x24   :  { %149 = vrot.lane.b32.xlu0 %v49_v5, %s503_s0  ;;  %147 = vrot.lane.b32.xlu1 %v48_v6, %s503_s0  ;;  %p479_p13 = por %p478_p12, %p477_p11 }
  0x25   :  { %384 = vmatpush3.msra.mxu0 %v50_v4 }
  0x26   :  { %385 = vmatprep.subr.mxu0 %v502_v0  ;;  %p480_p0 = pnand %p479_p13, %p473_p10 }
  0x27   :  { %386 = vmatpush3.msra.mxu0 %v49_v5 }
  0x28   :  { %145 = vrot.lane.b32.xlu0 %v47_v7, %s503_s0  ;;  %143 = vrot.lane.b32.xlu1 %v46_v8, %s503_s0 }
  0x29   :  { %387 = vmatprep.subr.mxu0 %v502_v0 }
  0x2a   :  { %388 = vmatpush3.msra.mxu0 %v48_v6 }
  0x2b   :  { %389 = vmatprep.subr.mxu0 %v502_v0 }
  0x2c   :  { %390 = vmatpush3.msra.mxu0 %v47_v7  ;;  %167 = vrot.lane.b32.xlu0 %v352_v9, %s503_s0 }
  0x2d   :  { %391 = vmatprep.subr.mxu0 %v502_v0 }
  0x2e   :  { %392 = vmatpush3.msra.mxu0 %v46_v8 }
  0x2f   :  { %394 = vmatmul.mubr.msk.f32.vlgmr.msra.gmra.mxu0 %vm61_vm1, %v44_v10  ;;  %415 = vmatprep.subr.mxu0 %v502_v0 }
  0x30   :  { %417 = vmatprep.mubr.msk.f32.mxu0 %vm504_vm0, %v502_v0  ;;  %416 = vmatpush3.msk.msra.mxu0 %vm262_vm3, %v45_v19 }
  0x8e   :  { %v158_v11 = vpop.permute.xlu0 %157  ;;  %v154_v12 = vpop.permute.xlu1 %153 }
  0x8f   :  { %397 = vmatpush3.msra.mxu1 %v158_v11 }
  0x90   :  { %398 = vmatprep.subr.mxu1 %v502_v0 }
  0x92   :  { %v156_v13 = vpop.permute.xlu0 %155  ;;  %v152_v14 = vpop.permute.xlu1 %151 }
  0x93   :  { %399 = vmatpush3.msra.mxu1 %v156_v13 }
  0x94   :  { %400 = vmatprep.subr.mxu1 %v502_v0 }
  0x95   :  { %401 = vmatpush3.msra.mxu1 %v154_v12 }
  0x96   :  { %402 = vmatprep.subr.mxu1 %v502_v0  ;;  %v150_v15 = vpop.permute.xlu0 %149  ;;  %v148_v16 = vpop.permute.xlu1 %147 }
  0x97   :  { %403 = vmatpush3.msra.mxu1 %v152_v14 }
  0x98   :  { %404 = vmatprep.subr.mxu1 %v502_v0 }
  0x99   :  { %405 = vmatpush3.msra.mxu1 %v150_v15 }
  0x9a   :  { %406 = vmatprep.subr.mxu1 %v502_v0  ;;  %v146_v17 = vpop.permute.xlu0 %145  ;;  %v144_v18 = vpop.permute.xlu1 %143 }
  0x9b   :  { %407 = vmatpush3.msra.mxu1 %v148_v16 }
  0x9c   :  { %408 = vmatprep.subr.mxu1 %v502_v0 }
  0x9d   :  { %409 = vmatpush3.msra.mxu1 %v146_v17 }
  0x9e   :  { %410 = vmatprep.subr.mxu1 %v502_v0  ;;  %v168_v24 = vpop.permute.xlu0 %167 }
  0x9f   :  { %411 = vmatpush3.msra.mxu1 %v144_v18 }
  0xa0   :  { %413 = vmatmul.mubr.msk.f32.vlgmr.msra.gmra.mxu1 %vm61_vm1, %v45_v19 }
  0xef   :  { %v131_v20 = vpop.f32.mrf.mxu0 }
  0xf0   :  { %v132_v27 = vadd.f32 %v352_v9, %v131_v20 }
  0xf1   :  { %v395_v21 = vpop.f32.mrf.mxu0 }
 0x160   :  { %v239_v26 = vpop.f32.mrf.mxu1 }
 0x161   :  { %v240_v28 = vadd.f32 %v239_v26, %v168_v24 }
 0x162   :  { %v414_v29 = vpop.f32.mrf.mxu1 }
 0x163   :  { %v246_v30 = vrot.slane %v240_v28, %v245_v25 }
 0x165   :  { %v247_v31 = vmul.f32 %v246_v30, %v132_v27 }
 0x167   :  { %v249_v32 = vsel %vm248_vm2, %v247_v31, 0.0 }
 0x168   :  { %250 = vadd.xlane.f32.xlu1 %v249_v32 }
 0x1f1   :  { %v251_v33 = vpop.xlane.xlu1 %250 }
 0x1f2   :  { %v252_v34 = vsub.f32 %v251_v33, %v251_v33 }
 0x1f4   :  { %v253_v35 = vmul.f32 1.442695, %v252_v34 }
 0x1f6   :  { %428 = vpow2.f32 %v253_v35 }
 0x203   :  { %v429_v36 = vpop.eup %428 }
 0x204   :  { %430 = vrcp.f32 %v429_v36 }
 0x211   :  { %v431_v37 = vpop.eup %430 }
 0x212   :  { %v257_v38 = vmul.f32 %v431_v37, %v429_v36 }
 0x214   :  { %418 = vmatmul.mubr.msk.f32.vlgmr.msra.gmra.mxu0 %vm258_vm4, %v257_v38 }
 0x2d4   :  { %v331_v39 = vpop.f32.mrf.mxu0 }
 0x2d5   :  { %335 = vst.msk [vmem:[#allocation7] sm:$0xff] %vm61_vm1, %v331_v39 }
 0x2d6   :  { %v419_v40 = vpop.f32.mrf.mxu0 }
 0x2d7   :  { %483 = shalt.err (!%p480_p0)
}
 0x2d8   :  { %345 = dma.vmem_to_hbm [thread:$0]  %s343_s29, 128, %s585_s4, [#allocation4]  }
 0x2d9   :  { %496 = dma.done.wait [#allocation4], 128  }
 0x2da   :  { %497 = vsyncadd [#allocation4], 4294967168 }
 0x2db   :  { %349 = vsyncpa [#allocation3], 1 }
 0x2dc   :  { %350 = vsyncpa [#allocation6], 1 }
 0x2dd   :  { %351 = vsyncpa [#allocation4], 1 }

</bundles_post_ra>
